<compile_context>
chip_gen: v6e
topology: v6e:2x2x1
jax: 0.10.0
libtpu: 0.0.40
codegen_flags: <defaults>
</compile_context>

<pallas_src>
import jax
import jax.numpy as jnp
from jax import lax
from jax.experimental import pallas as pl
from jax.experimental.pallas import tpu as pltpu

LENGTHSCALE = 1.0
OUTPUTSCALE = 1.0
JITTER = 1e-3                      # gpytorch LazyTensor.add_jitter() default
_INV_LS2 = 1.0 / (LENGTHSCALE * LENGTHSCALE)

_VMEM_LIMIT = 32 * 1024 * 1024     # explicit budget: fits v5e/v6e/v7x scoped VMEM


# ----------------------------------------------------------------------------
# Kernel 1: tiled RBF cross-covariance  K(A, B)[i, j]
#   = outputscale * exp(-0.5 * ||a_i - b_j||^2 / lengthscale^2)
# Row/column squared norms are precomputed (1 pass each) and streamed in as
# (tr, 1) / (1, tc) panels — no in-kernel reductions, no transposes, no masks.
# Per tile: one MXU Gram matmul (last-dim contraction on both operands) and
# one EUP exp per element (the kernel's bound).
# ----------------------------------------------------------------------------
def _rbf_cross_kernel(asq_ref, bsq_ref, a_ref, b_ref, o_ref):
    gram = lax.dot_general(a_ref[...], b_ref[...], (((1,), (1,)), ((), ())),
                           preferred_element_type=jnp.float32)        # (tr, tc)
    d2 = jnp.maximum(asq_ref[...] + bsq_ref[...] - 2.0 * gram, 0.0)   # (tr, tc)
    o_ref[...] = OUTPUTSCALE * jnp.exp((-0.5 * _INV_LS2) * d2)


def rbf_cross(a, b, *, tr=512, tc=512):
    """K(a, b) of shape (Ra, Rb) for a:(Ra, D), b:(Rb, D)."""
    Ra, D = a.shape
    Rb, _ = b.shape
    tr = min(tr, Ra)
    tc = min(tc, Rb)
    a_sq = jnp.sum(a * a, axis=-1, keepdims=True)                     # (Ra, 1)
    b_sq = jnp.sum(b * b, axis=-1)[None, :]                           # (1, Rb)
    grid = (pl.cdiv(Ra, tr), pl.cdiv(Rb, tc))
    return pl.pallas_call(
        _rbf_cross_kernel,
        out_shape=jax.ShapeDtypeStruct((Ra, Rb), jnp.float32),
        grid=grid,
        in_specs=[pl.BlockSpec((tr, 1), lambda i, j: (i, 0)),
                  pl.BlockSpec((1, tc), lambda i, j: (0, j)),
                  pl.BlockSpec((tr, D), lambda i, j: (i, 0)),
                  pl.BlockSpec((tc, D), lambda i, j: (j, 0))],
        out_specs=pl.BlockSpec((tr, tc), lambda i, j: (i, j)),
        compiler_params=pltpu.CompilerParams(
            dimension_semantics=("parallel", "parallel"),
            vmem_limit_bytes=_VMEM_LIMIT),
    )(a_sq, b_sq, a, b)


# ----------------------------------------------------------------------------
# Kernel 2: predictive mean + diagonal correction, 1-D grid over column panels.
#   mean[n]      = test_mean[n] + sum_m delta[m] * inv_prod[m, n]      (VPU)
#   diag_corr[n] = clamp(diag(Kxx)[n] - sum_m inv_prod[m,n]*Kux[m,n], 0)
# diag(Kxx) == OUTPUTSCALE for an RBF kernel (constant).
# ----------------------------------------------------------------------------
def _mean_diag_kernel(delta_ref, test_mean_ref, inv_prod_ref, kux_ref,
                      mean_ref, dcor_ref):
    ip = inv_prod_ref[...]                                            # (M, tn)
    mean_ref[...] = test_mean_ref[...] + jnp.sum(
        delta_ref[...] * ip, axis=0, keepdims=True)                   # (1, tn)
    fake_diag = jnp.sum(ip * kux_ref[...], axis=0, keepdims=True)     # (1, tn)
    dcor_ref[...] = jnp.maximum(OUTPUTSCALE - fake_diag, 0.0)


def _mean_and_diag_correction(delta_col, test_mean_row, inv_prod, kux, *, tn=256):
    M, N = inv_prod.shape
    tn = min(tn, N)
    grid = (pl.cdiv(N, tn),)
    return pl.pallas_call(
        _mean_diag_kernel,
        out_shape=(jax.ShapeDtypeStruct((1, N), jnp.float32),
                   jax.ShapeDtypeStruct((1, N), jnp.float32)),
        grid=grid,
        in_specs=[pl.BlockSpec((M, 1), lambda j: (0, 0)),
                  pl.BlockSpec((1, tn), lambda j: (0, j)),
                  pl.BlockSpec((M, tn), lambda j: (0, j)),
                  pl.BlockSpec((M, tn), lambda j: (0, j))],
        out_specs=(pl.BlockSpec((1, tn), lambda j: (0, j)),
                   pl.BlockSpec((1, tn), lambda j: (0, j))),
        compiler_params=pltpu.CompilerParams(
            dimension_semantics=("parallel",),
            vmem_limit_bytes=_VMEM_LIMIT),
    )(delta_col, test_mean_row, inv_prod, kux)


# ----------------------------------------------------------------------------
# Kernel 3: tiled predictive covariance (MXU-bound).
#   factor  = L_q @ inv_prod                       (precomputed, O(M^2 N))
#   covar   = factor^T @ factor + diag(diag_corr)  (this kernel, O(N^2 M))
# Tile (i, j): ft_i @ ft_j^T — single matmul, last-dim contraction on both
# operands (no in-kernel transpose / XLU pass).  Diagonal correction is added
# only on diagonal tiles; exactly one store per tile.
# ----------------------------------------------------------------------------
def _covar_kernel(ft_i_ref, ft_j_ref, dcor_ref, o_ref):
    cov = lax.dot_general(ft_i_ref[...], ft_j_ref[...],
                          (((1,), (1,)), ((), ())),
                          preferred_element_type=jnp.float32)         # (tn, tn)
    i = pl.program_id(0)
    j = pl.program_id(1)

    @pl.when(i == j)
    def _():
        r, c = o_ref.shape
        rows = lax.broadcasted_iota(jnp.int32, (r, c), 0)
        cols = lax.broadcasted_iota(jnp.int32, (r, c), 1)
        o_ref[...] = cov + jnp.where(rows == cols, dcor_ref[...], 0.0)

    @pl.when(i != j)
    def _():
        o_ref[...] = cov


def _predictive_covar(factor_t, diag_corr, *, tn=256):
    N, M = factor_t.shape
    tn = min(tn, N)
    grid = (pl.cdiv(N, tn), pl.cdiv(N, tn))
    return pl.pallas_call(
        _covar_kernel,
        out_shape=jax.ShapeDtypeStruct((N, N), jnp.float32),
        grid=grid,
        in_specs=[pl.BlockSpec((tn, M), lambda i, j: (i, 0)),
                  pl.BlockSpec((tn, M), lambda i, j: (j, 0)),
                  pl.BlockSpec((1, tn), lambda i, j: (0, j))],
        out_specs=pl.BlockSpec((tn, tn), lambda i, j: (i, j)),
        compiler_params=pltpu.CompilerParams(
            dimension_semantics=("parallel", "parallel"),
            vmem_limit_bytes=_VMEM_LIMIT),
    )(factor_t, factor_t, diag_corr)


# ----------------------------------------------------------------------------
# VariationalStrategy.forward equivalent
# ----------------------------------------------------------------------------
def variational_strategy_forward(x, inducing_points, var_mean, var_chol):
    """Returns (predictive_mean [N], predictive_covar [N, N]) of q(f|x)."""
    # torch.equal(x, inducing_points) fast path -> static identity check so the
    # whole forward remains jit-able (no device->host sync / tracer-to-bool).
    if x is inducing_points:
        return var_mean, var_chol @ var_chol.T

    M = inducing_points.shape[-2]
    N = x.shape[-2]

    # model.forward: zero mean, (scaled) RBF covariance.  Only the needed
    # blocks are formed; diag(Kxx) == OUTPUTSCALE so Kxx is never built.
    kuu = rbf_cross(inducing_points, inducing_points)                  # (M, M)
    kuu = kuu + JITTER * jnp.eye(M, dtype=jnp.float32)
    kux = rbf_cross(inducing_points, x)                                # (M, N), lane-dense

    induc_mean = jnp.zeros((M,), jnp.float32)
    test_mean = jnp.zeros((N,), jnp.float32)

    # TODO(synk): Cholesky factorization / triangular solve (Kuu^{-1} Kux) has
    # no clean Pallas TPU primitive; kept in jax.scipy.linalg (XLA).
    cf = jax.scipy.linalg.cho_factor(kuu, lower=True)
    inv_prod = jax.scipy.linalg.cho_solve(cf, kux)                     # (M, N)

    delta_col = (var_mean - induc_mean)[:, None]                       # (M, 1)
    mean_row, diag_corr = _mean_and_diag_correction(
        delta_col, test_mean[None, :], inv_prod, kux)

    # factor = L_q @ inv_prod ; covar = factor^T factor.  The fold-in is
    # O(M^2 N) (tiny vs the O(N^2 M) covar kernel) and halves per-tile MXU work.
    factor_t = (var_chol @ inv_prod).T                                 # (N, M), XLA
    covar = _predictive_covar(factor_t, diag_corr)
    return mean_row[0], covar


# ----------------------------------------------------------------------------
# Pure-JAX reference (for correctness check only)
# ----------------------------------------------------------------------------
def _reference_forward(x, z, var_mean, var_chol):
    def k(a, b):
        d2 = jnp.sum((a[:, None, :] - b[None, :, :]) ** 2, axis=-1)
        return OUTPUTSCALE * jnp.exp(-0.5 * d2 * _INV_LS2)
    M = z.shape[0]
    kuu = k(z, z) + JITTER * jnp.eye(M, dtype=jnp.float32)
    kux = k(z, x)
    inv_prod = jnp.linalg.solve(kuu, kux)
    mean = inv_prod.T @ var_mean
    factor = var_chol @ inv_prod
    covar = factor.T @ factor
    fake = jnp.sum(inv_prod * kux, axis=0)
    covar = covar + jnp.diag(jnp.clip(OUTPUTSCALE - fake, 0.0, None))
    return mean, covar


if __name__ == "__main__":
    key = jax.random.PRNGKey(0)
    k_z, k_x, k_m, k_l = jax.random.split(key, 4)

    M, N, D = 8, 16, 4  # inducing points, test points, input features

    inducing_points = jax.random.normal(k_z, (M, D), dtype=jnp.float32)
    x = jax.random.normal(k_x, (N, D), dtype=jnp.float32)

    # deterministic variational parameters: q(u) = N(m, L L^T)
    var_mean = 0.1 * jax.random.normal(k_m, (M,), dtype=jnp.float32)
    raw = 0.05 * jax.random.normal(k_l, (M, M), dtype=jnp.float32)
    var_chol = jnp.tril(raw, -1) + 0.5 * jnp.eye(M, dtype=jnp.float32)

    fwd = jax.jit(variational_strategy_forward)
    pred_mean, pred_covar = fwd(x, inducing_points, var_mean, var_chol)
    jax.block_until_ready((pred_mean, pred_covar))

    assert pred_mean.shape == (N,)
    assert pred_covar.shape == (N, N)

    ref_mean, ref_covar = _reference_forward(x, inducing_points, var_mean, var_chol)
    assert jnp.allclose(pred_mean, ref_mean, rtol=2e-3, atol=2e-3)
    assert jnp.allclose(pred_covar, ref_covar, rtol=2e-3, atol=2e-3)
    print("KERNEL_OK")
</pallas_src>

<mosaic_0001>
module attributes {stable_mosaic.version = 11 : i64} {
  func.func @_rbf_cross_kernel(%arg0: i32, %arg1: i32, %arg2: memref<8x1xf32, #tpu.memory_space<vmem>>, %arg3: memref<1x8xf32, #tpu.memory_space<vmem>>, %arg4: memref<8x4xf32, #tpu.memory_space<vmem>>, %arg5: memref<8x4xf32, #tpu.memory_space<vmem>>, %arg6: memref<8x8xf32, #tpu.memory_space<vmem>>) attributes {dimension_semantics = [#tpu.dimension_semantics<parallel>, #tpu.dimension_semantics<parallel>], iteration_bounds = array<i64: 1, 1>, scalar_prefetch = 0 : i64, scratch_operands = 0 : i64, tpu.core_type = #tpu.core_type<tc>, window_params = [{transform_indices = @transform_0, window_bounds = array<i64: 8, 1>}, {transform_indices = @transform_1, window_bounds = array<i64: 1, 8>}, {transform_indices = @transform_2, window_bounds = array<i64: 8, 4>}, {transform_indices = @transform_3, window_bounds = array<i64: 8, 4>}, {transform_indices = @transform_4, window_bounds = array<i64: 8, 8>}]} {
    %c0 = arith.constant 0 : index
    %c0_0 = arith.constant 0 : index
    %0 = vector.load %arg4[%c0, %c0_0] : memref<8x4xf32, #tpu.memory_space<vmem>>, vector<8x4xf32>
    %c0_1 = arith.constant 0 : index
    %c0_2 = arith.constant 0 : index
    %1 = vector.load %arg5[%c0_1, %c0_2] : memref<8x4xf32, #tpu.memory_space<vmem>>, vector<8x4xf32>
    %cst = arith.constant dense<0.000000e+00> : vector<8x8xf32>
    %2 = tpu.matmul %0, %1, %cst {dimension_numbers = #tpu.dot_dimension_numbers<[1], [1], [0], [0], [0, 0, 1, 0], [], []>} : vector<8x4xf32>, vector<8x4xf32>, vector<8x8xf32> -> vector<8x8xf32>
    %c0_3 = arith.constant 0 : index
    %c0_4 = arith.constant 0 : index
    %3 = vector.load %arg2[%c0_3, %c0_4] : memref<8x1xf32, #tpu.memory_space<vmem>>, vector<8x1xf32>
    %c0_5 = arith.constant 0 : index
    %c0_6 = arith.constant 0 : index
    %4 = vector.load %arg3[%c0_5, %c0_6] : memref<1x8xf32, #tpu.memory_space<vmem>>, vector<1x8xf32>
    %5 = vector.broadcast %3 : vector<8x1xf32> to vector<8x8xf32>
    %6 = vector.broadcast %4 : vector<1x8xf32> to vector<8x8xf32>
    %7 = arith.addf %5, %6 : vector<8x8xf32>
    %cst_7 = arith.constant 2.000000e+00 : f32
    %8 = vector.broadcast %cst_7 : f32 to vector<8x8xf32>
    %9 = arith.mulf %8, %2 : vector<8x8xf32>
    %10 = arith.subf %7, %9 : vector<8x8xf32>
    %cst_8 = arith.constant 0.000000e+00 : f32
    %11 = vector.broadcast %cst_8 : f32 to vector<8x8xf32>
    %12 = arith.maximumf %10, %11 : vector<8x8xf32>
    %cst_9 = arith.constant -5.000000e-01 : f32
    %13 = vector.broadcast %cst_9 : f32 to vector<8x8xf32>
    %14 = arith.mulf %13, %12 : vector<8x8xf32>
    %15 = math.exp %14 : vector<8x8xf32>
    %cst_10 = arith.constant 1.000000e+00 : f32
    %16 = vector.broadcast %cst_10 : f32 to vector<8x8xf32>
    %17 = arith.mulf %16, %15 : vector<8x8xf32>
    %c0_11 = arith.constant 0 : index
    %c0_12 = arith.constant 0 : index
    %18 = vector.load %arg6[%c0_11, %c0_12] : memref<8x8xf32, #tpu.memory_space<vmem>>, vector<8x8xf32>
    tpu.vector_store %arg6[%c0_11, %c0_12], %17 {strides = array<i32>} : memref<8x8xf32, #tpu.memory_space<vmem>>, vector<8x8xf32>,
    return
  }
  func.func @transform_0(%arg0: i32, %arg1: i32) -> (i32, i32) {
    %c0_i32 = arith.constant 0 : i32
    %c0_i32_0 = arith.constant 0 : i32
    return %arg0, %c0_i32 : i32, i32
  }
  func.func @transform_1(%arg0: i32, %arg1: i32) -> (i32, i32) {
    %c0_i32 = arith.constant 0 : i32
    %c0_i32_0 = arith.constant 0 : i32
    return %c0_i32, %arg1 : i32, i32
  }
  func.func @transform_2(%arg0: i32, %arg1: i32) -> (i32, i32) {
    %c0_i32 = arith.constant 0 : i32
    %c0_i32_0 = arith.constant 0 : i32
    return %arg0, %c0_i32 : i32, i32
  }
  func.func @transform_3(%arg0: i32, %arg1: i32) -> (i32, i32) {
    %c0_i32 = arith.constant 0 : i32
    %c0_i32_0 = arith.constant 0 : i32
    return %arg1, %c0_i32 : i32, i32
  }
  func.func @transform_4(%arg0: i32, %arg1: i32) -> (i32, i32) {
    %c0_i32 = arith.constant 0 : i32
    return %arg0, %arg1 : i32, i32
  }
}

module attributes {stable_mosaic.version = 11 : i64} {
  func.func @_rbf_cross_kernel(%arg0: i32, %arg1: i32, %arg2: memref<8x1xf32, #tpu.memory_space<vmem>>, %arg3: memref<1x16xf32, #tpu.memory_space<vmem>>, %arg4: memref<8x4xf32, #tpu.memory_space<vmem>>, %arg5: memref<16x4xf32, #tpu.memory_space<vmem>>, %arg6: memref<8x16xf32, #tpu.memory_space<vmem>>) attributes {dimension_semantics = [#tpu.dimension_semantics<parallel>, #tpu.dimension_semantics<parallel>], iteration_bounds = array<i64: 1, 1>, scalar_prefetch = 0 : i64, scratch_operands = 0 : i64, tpu.core_type = #tpu.core_type<tc>, window_params = [{transform_indices = @transform_0, window_bounds = array<i64: 8, 1>}, {transform_indices = @transform_1, window_bounds = array<i64: 1, 16>}, {transform_indices = @transform_2, window_bounds = array<i64: 8, 4>}, {transform_indices = @transform_3, window_bounds = array<i64: 16, 4>}, {transform_indices = @transform_4, window_bounds = array<i64: 8, 16>}]} {
    %c0 = arith.constant 0 : index
    %c0_0 = arith.constant 0 : index
    %0 = vector.load %arg4[%c0, %c0_0] : memref<8x4xf32, #tpu.memory_space<vmem>>, vector<8x4xf32>
    %c0_1 = arith.constant 0 : index
    %c0_2 = arith.constant 0 : index
    %1 = vector.load %arg5[%c0_1, %c0_2] : memref<16x4xf32, #tpu.memory_space<vmem>>, vector<16x4xf32>
    %cst = arith.constant dense<0.000000e+00> : vector<8x16xf32>
    %2 = tpu.matmul %0, %1, %cst {dimension_numbers = #tpu.dot_dimension_numbers<[1], [1], [0], [0], [0, 0, 1, 0], [], []>} : vector<8x4xf32>, vector<16x4xf32>, vector<8x16xf32> -> vector<8x16xf32>
    %c0_3 = arith.constant 0 : index
    %c0_4 = arith.constant 0 : index
    %3 = vector.load %arg2[%c0_3, %c0_4] : memref<8x1xf32, #tpu.memory_space<vmem>>, vector<8x1xf32>
    %c0_5 = arith.constant 0 : index
    %c0_6 = arith.constant 0 : index
    %4 = vector.load %arg3[%c0_5, %c0_6] : memref<1x16xf32, #tpu.memory_space<vmem>>, vector<1x16xf32>
    %5 = vector.broadcast %3 : vector<8x1xf32> to vector<8x16xf32>
    %6 = vector.broadcast %4 : vector<1x16xf32> to vector<8x16xf32>
    %7 = arith.addf %5, %6 : vector<8x16xf32>
    %cst_7 = arith.constant 2.000000e+00 : f32
    %8 = vector.broadcast %cst_7 : f32 to vector<8x16xf32>
    %9 = arith.mulf %8, %2 : vector<8x16xf32>
    %10 = arith.subf %7, %9 : vector<8x16xf32>
    %cst_8 = arith.constant 0.000000e+00 : f32
    %11 = vector.broadcast %cst_8 : f32 to vector<8x16xf32>
    %12 = arith.maximumf %10, %11 : vector<8x16xf32>
    %cst_9 = arith.constant -5.000000e-01 : f32
    %13 = vector.broadcast %cst_9 : f32 to vector<8x16xf32>
    %14 = arith.mulf %13, %12 : vector<8x16xf32>
    %15 = math.exp %14 : vector<8x16xf32>
    %cst_10 = arith.constant 1.000000e+00 : f32
    %16 = vector.broadcast %cst_10 : f32 to vector<8x16xf32>
    %17 = arith.mulf %16, %15 : vector<8x16xf32>
    %c0_11 = arith.constant 0 : index
    %c0_12 = arith.constant 0 : index
    %18 = vector.load %arg6[%c0_11, %c0_12] : memref<8x16xf32, #tpu.memory_space<vmem>>, vector<8x16xf32>
    tpu.vector_store %arg6[%c0_11, %c0_12], %17 {strides = array<i32>} : memref<8x16xf32, #tpu.memory_space<vmem>>, vector<8x16xf32>,
    return
  }
  func.func @transform_0(%arg0: i32, %arg1: i32) -> (i32, i32) {
    %c0_i32 = arith.constant 0 : i32
    %c0_i32_0 = arith.constant 0 : i32
    return %arg0, %c0_i32 : i32, i32
  }
  func.func @transform_1(%arg0: i32, %arg1: i32) -> (i32, i32) {
    %c0_i32 = arith.constant 0 : i32
    %c0_i32_0 = arith.constant 0 : i32
    return %c0_i32, %arg1 : i32, i32
  }
  func.func @transform_2(%arg0: i32, %arg1: i32) -> (i32, i32) {
    %c0_i32 = arith.constant 0 : i32
    %c0_i32_0 = arith.constant 0 : i32
    return %arg0, %c0_i32 : i32, i32
  }
  func.func @transform_3(%arg0: i32, %arg1: i32) -> (i32, i32) {
    %c0_i32 = arith.constant 0 : i32
    %c0_i32_0 = arith.constant 0 : i32
    return %arg1, %c0_i32 : i32, i32
  }
  func.func @transform_4(%arg0: i32, %arg1: i32) -> (i32, i32) {
    %c0_i32 = arith.constant 0 : i32
    return %arg0, %arg1 : i32, i32
  }
}

module attributes {stable_mosaic.version = 11 : i64} {
  func.func @_mean_diag_kernel(%arg0: i32, %arg1: memref<8x1xf32, #tpu.memory_space<vmem>>, %arg2: memref<1x16xf32, #tpu.memory_space<vmem>>, %arg3: memref<8x16xf32, #tpu.memory_space<vmem>>, %arg4: memref<8x16xf32, #tpu.memory_space<vmem>>, %arg5: memref<1x16xf32, #tpu.memory_space<vmem>>, %arg6: memref<1x16xf32, #tpu.memory_space<vmem>>) attributes {dimension_semantics = [#tpu.dimension_semantics<parallel>], iteration_bounds = array<i64: 1>, scalar_prefetch = 0 : i64, scratch_operands = 0 : i64, tpu.core_type = #tpu.core_type<tc>, window_params = [{pipeline_mode = #tpu.pipeline_mode<synchronous>, transform_indices = @transform_0, window_bounds = array<i64: 8, 1>}, {transform_indices = @transform_1, window_bounds = array<i64: 1, 16>}, {transform_indices = @transform_2, window_bounds = array<i64: 8, 16>}, {transform_indices = @transform_3, window_bounds = array<i64: 8, 16>}, {transform_indices = @transform_4, window_bounds = array<i64: 1, 16>}, {transform_indices = @transform_5, window_bounds = array<i64: 1, 16>}]} {
    %c0 = arith.constant 0 : index
    %c0_0 = arith.constant 0 : index
    %0 = vector.load %arg3[%c0, %c0_0] : memref<8x16xf32, #tpu.memory_space<vmem>>, vector<8x16xf32>
    %c0_1 = arith.constant 0 : index
    %c0_2 = arith.constant 0 : index
    %1 = vector.load %arg2[%c0_1, %c0_2] : memref<1x16xf32, #tpu.memory_space<vmem>>, vector<1x16xf32>
    %c0_3 = arith.constant 0 : index
    %c0_4 = arith.constant 0 : index
    %2 = vector.load %arg1[%c0_3, %c0_4] : memref<8x1xf32, #tpu.memory_space<vmem>>, vector<8x1xf32>
    %3 = vector.broadcast %2 : vector<8x1xf32> to vector<8x16xf32>
    %4 = arith.mulf %3, %0 : vector<8x16xf32>
    %cst = arith.constant dense<0.000000e+00> : vector<16xf32>
    %5 = vector.multi_reduction <add>, %4, %cst [0] : vector<8x16xf32> to vector<16xf32>
    %6 = vector.shape_cast %5 : vector<16xf32> to vector<1x16xf32>
    %7 = arith.addf %1, %6 : vector<1x16xf32>
    %c0_5 = arith.constant 0 : index
    %c0_6 = arith.constant 0 : index
    %8 = vector.load %arg5[%c0_5, %c0_6] : memref<1x16xf32, #tpu.memory_space<vmem>>, vector<1x16xf32>
    tpu.vector_store %arg5[%c0_5, %c0_6], %7 {strides = array<i32>} : memref<1x16xf32, #tpu.memory_space<vmem>>, vector<1x16xf32>,
    %c0_7 = arith.constant 0 : index
    %c0_8 = arith.constant 0 : index
    %9 = vector.load %arg4[%c0_7, %c0_8] : memref<8x16xf32, #tpu.memory_space<vmem>>, vector<8x16xf32>
    %10 = arith.mulf %0, %9 : vector<8x16xf32>
    %cst_9 = arith.constant dense<0.000000e+00> : vector<16xf32>
    %11 = vector.multi_reduction <add>, %10, %cst_9 [0] : vector<8x16xf32> to vector<16xf32>
    %12 = vector.shape_cast %11 : vector<16xf32> to vector<1x16xf32>
    %cst_10 = arith.constant 1.000000e+00 : f32
    %13 = vector.broadcast %cst_10 : f32 to vector<1x16xf32>
    %14 = arith.subf %13, %12 : vector<1x16xf32>
    %cst_11 = arith.constant 0.000000e+00 : f32
    %15 = vector.broadcast %cst_11 : f32 to vector<1x16xf32>
    %16 = arith.maximumf %14, %15 : vector<1x16xf32>
    %c0_12 = arith.constant 0 : index
    %c0_13 = arith.constant 0 : index
    %17 = vector.load %arg6[%c0_12, %c0_13] : memref<1x16xf32, #tpu.memory_space<vmem>>, vector<1x16xf32>
    tpu.vector_store %arg6[%c0_12, %c0_13], %16 {strides = array<i32>} : memref<1x16xf32, #tpu.memory_space<vmem>>, vector<1x16xf32>,
    return
  }
  func.func @transform_0(%arg0: i32) -> (i32, i32) {
    %c0_i32 = arith.constant 0 : i32
    %c0_i32_0 = arith.constant 0 : i32
    %c0_i32_1 = arith.constant 0 : i32
    return %c0_i32, %c0_i32_0 : i32, i32
  }
  func.func @transform_1(%arg0: i32) -> (i32, i32) {
    %c0_i32 = arith.constant 0 : i32
    %c0_i32_0 = arith.constant 0 : i32
    return %c0_i32, %arg0 : i32, i32
  }
  func.func @transform_2(%arg0: i32) -> (i32, i32) {
    %c0_i32 = arith.constant 0 : i32
    %c0_i32_0 = arith.constant 0 : i32
    return %c0_i32, %arg0 : i32, i32
  }
  func.func @transform_3(%arg0: i32) -> (i32, i32) {
    %c0_i32 = arith.constant 0 : i32
    %c0_i32_0 = arith.constant 0 : i32
    return %c0_i32, %arg0 : i32, i32
  }
  func.func @transform_4(%arg0: i32) -> (i32, i32) {
    %c0_i32 = arith.constant 0 : i32
    %c0_i32_0 = arith.constant 0 : i32
    return %c0_i32, %arg0 : i32, i32
  }
  func.func @transform_5(%arg0: i32) -> (i32, i32) {
    %c0_i32 = arith.constant 0 : i32
    %c0_i32_0 = arith.constant 0 : i32
    return %c0_i32, %arg0 : i32, i32
  }
}

module attributes {stable_mosaic.version = 11 : i64} {
  func.func @_covar_kernel(%arg0: i32, %arg1: i32, %arg2: memref<16x8xf32, #tpu.memory_space<vmem>>, %arg3: memref<16x8xf32, #tpu.memory_space<vmem>>, %arg4: memref<1x16xf32, #tpu.memory_space<vmem>>, %arg5: memref<16x16xf32, #tpu.memory_space<vmem>>) attributes {dimension_semantics = [#tpu.dimension_semantics<parallel>, #tpu.dimension_semantics<parallel>], iteration_bounds = array<i64: 1, 1>, scalar_prefetch = 0 : i64, scratch_operands = 0 : i64, tpu.core_type = #tpu.core_type<tc>, window_params = [{transform_indices = @transform_0, window_bounds = array<i64: 16, 8>}, {transform_indices = @transform_1, window_bounds = array<i64: 16, 8>}, {transform_indices = @transform_2, window_bounds = array<i64: 1, 16>}, {transform_indices = @transform_3, window_bounds = array<i64: 16, 16>}]} {
    %c0 = arith.constant 0 : index
    %c0_0 = arith.constant 0 : index
    %0 = vector.load %arg2[%c0, %c0_0] : memref<16x8xf32, #tpu.memory_space<vmem>>, vector<16x8xf32>
    %c0_1 = arith.constant 0 : index
    %c0_2 = arith.constant 0 : index
    %1 = vector.load %arg3[%c0_1, %c0_2] : memref<16x8xf32, #tpu.memory_space<vmem>>, vector<16x8xf32>
    %cst = arith.constant dense<0.000000e+00> : vector<16x16xf32>
    %2 = tpu.matmul %0, %1, %cst {dimension_numbers = #tpu.dot_dimension_numbers<[1], [1], [0], [0], [0, 0, 1, 0], [], []>} : vector<16x8xf32>, vector<16x8xf32>, vector<16x16xf32> -> vector<16x16xf32>
    %3 = arith.cmpi eq, %arg0, %arg1 : i32
    %4 = arith.extui %3 : i1 to i32
    %c0_i32 = arith.constant 0 : i32
    %5 = arith.cmpi ne, %4, %c0_i32 : i32
    scf.if %5 {
      %9 = tpu.iota {dimensions = array<i32: 0>} : vector<16x16xi32>
      %10 = tpu.iota {dimensions = array<i32: 1>} : vector<16x16xi32>
      %11 = arith.cmpi eq, %9, %10 : vector<16x16xi32>
      %c0_4 = arith.constant 0 : index
      %c0_5 = arith.constant 0 : index
      %12 = vector.load %arg4[%c0_4, %c0_5] : memref<1x16xf32, #tpu.memory_space<vmem>>, vector<1x16xf32>
      %cst_6 = arith.constant 0.000000e+00 : f32
      %13 = vector.shape_cast %12 : vector<1x16xf32> to vector<1x16xf32>
      %14 = vector.broadcast %13 : vector<1x16xf32> to vector<16x16xf32>
      %15 = vector.broadcast %cst_6 : f32 to vector<16x16xf32>
      %16 = arith.select %11, %14, %15 : vector<16x16xi1>, vector<16x16xf32>
      %17 = arith.addf %2, %16 : vector<16x16xf32>
      %c0_7 = arith.constant 0 : index
      %c0_8 = arith.constant 0 : index
      %18 = vector.load %arg5[%c0_7, %c0_8] : memref<16x16xf32, #tpu.memory_space<vmem>>, vector<16x16xf32>
      tpu.vector_store %arg5[%c0_7, %c0_8], %17 {strides = array<i32>} : memref<16x16xf32, #tpu.memory_space<vmem>>, vector<16x16xf32>,
    } else {
    }
    %6 = arith.cmpi ne, %arg0, %arg1 : i32
    %7 = arith.extui %6 : i1 to i32
    %c0_i32_3 = arith.constant 0 : i32
    %8 = arith.cmpi ne, %7, %c0_i32_3 : i32
    scf.if %8 {
      %c0_4 = arith.constant 0 : index
      %c0_5 = arith.constant 0 : index
      %9 = vector.load %arg5[%c0_4, %c0_5] : memref<16x16xf32, #tpu.memory_space<vmem>>, vector<16x16xf32>
      tpu.vector_store %arg5[%c0_4, %c0_5], %2 {strides = array<i32>} : memref<16x16xf32, #tpu.memory_space<vmem>>, vector<16x16xf32>,
    } else {
    }
    return
  }
  func.func @transform_0(%arg0: i32, %arg1: i32) -> (i32, i32) {
    %c0_i32 = arith.constant 0 : i32
    %c0_i32_0 = arith.constant 0 : i32
    return %arg0, %c0_i32 : i32, i32
  }
  func.func @transform_1(%arg0: i32, %arg1: i32) -> (i32, i32) {
    %c0_i32 = arith.constant 0 : i32
    %c0_i32_0 = arith.constant 0 : i32
    return %arg1, %c0_i32 : i32, i32
  }
  func.func @transform_2(%arg0: i32, %arg1: i32) -> (i32, i32) {
    %c0_i32 = arith.constant 0 : i32
    %c0_i32_0 = arith.constant 0 : i32
    return %c0_i32, %arg1 : i32, i32
  }
  func.func @transform_3(%arg0: i32, %arg1: i32) -> (i32, i32) {
    %c0_i32 = arith.constant 0 : i32
    return %arg0, %arg1 : i32, i32
  }
}

</mosaic_0001>

<bundles_post_ra>
// kernel: custom-call.6
= control target key start
LH: loop header
LB: loop body
LE: loop exit
PB: predicated region body
PF: predicated region fallthrough
CT: control target
= control target key end

     0   :  { %v266_v0 = vmov 0.0   ;;  %vm36_vm0 = vcmask 7168   ;;  %vm54_vm1 = vcmask 15368   ;;  %vm71_vm2 = vcmask 1047553   ;;  %s294_s0 = inlined_call_operand.vmem [shape: f32[8,8], index: 0, kind: input, shape index: {}]   ;;  %s295_s1 = inlined_call_operand.vmem [shape: f32[8,8], index: 1, kind: output, shape index: {}]  }
   0x1   :  { %35 = vst [vmem:[#allocation1] sm:$0xff] %v266_v0  ;;  %v280_v4 = vld [vmem:[%s294_s0] sm:$0xff]  ;;  %vm72_vm3 = vmand %vm54_vm1, %vm71_vm2  ;;  %vm76_vm4 = vcmask 23568   ;;  %vm93_vm5 = vcmask 1047554   ;;  %vm98_vm7 = vcmask 31768   ;;  %vm115_vm8 = vcmask 1047555  }
   0x2   :  { %31 = vst [vmem:[#allocation0] sm:$0xff] %v280_v4  ;;  %vm94_vm6 = vmand %vm76_vm4, %vm93_vm5  ;;  %vm120_vm10 = vcmask 39968   ;;  %vm137_vm11 = vcmask 1047556   ;;  %vm142_vm13 = vcmask 48168   ;;  %vm159_vm14 = vcmask 1047557  }
   0x3   :  { %vm116_vm9 = vmand %vm98_vm7, %vm115_vm8  ;;  %vm181_vm1 = vcmask 1047558   ;;  %vm203_vm4 = vcmask 1047559  }
   0x4   :  { %vm138_vm12 = vmand %vm120_vm10, %vm137_vm11 }
   0x5   :  { %vm160_vm15 = vmand %vm142_vm13, %vm159_vm14 }
   0x8   :  { %v37_v1 = vld [vmem:[#allocation1] ss:$0 sm:$0xff] }
   0x9   :  { %v39_v2 = vmul.f32 %v37_v1, %v37_v1  ;;  %v46_v3 = vmul.f32 0.0, %v37_v1  ;;  %v38_v5 = vld [vmem:[#allocation0] ss:$0 sm:$0xff]  ;;  %v58_v16 = vld [vmem:[#allocation0 + $0x1] ss:$0 sm:$0xff] }
   0xa   :  { %v80_v28 = vld [vmem:[#allocation0 + $0x2] ss:$0 sm:$0xff]  ;;  %v102_v40 = vld [vmem:[#allocation0 + $0x3] ss:$0 sm:$0xff]  ;;  %v124_v52 = vld [vmem:[#allocation0 + $0x4] ss:$0 sm:$0xff] }
   0xb   :  { %40 = vadd.xlane.f32.xlu0 %v39_v2  ;;  %v146_v0 = vld [vmem:[#allocation0 + $0x5] ss:$0 sm:$0xff] }
   0xf   :  { %47 = vadd.xlane.f32.xlu0 %v46_v3 }
  0x94   :  { %v41_v6 = vpop.xlane.xlu0 %40 }
  0x95   :  { %v42_v7 = vsub.f32 %v38_v5, %v41_v6 }
  0x97   :  { %250 = vrsqrt.f32 %v42_v7 }
  0x98   :  { %v48_v8 = vpop.xlane.xlu0 %47 }
  0x99   :  { %v49_v9 = vsub.f32 %v280_v4, %v48_v8 }
  0xa4   :  { %v251_v10 = vpop.eup %250 }
  0xa5   :  { %v50_v11 = vmul.f32 %v251_v10, %v49_v9 }
  0xa7   :  { %v51_v12 = vsel %vm36_vm0, %v50_v11, 0.0  ;;  %vm164_vm0 = vcmask 56368  }
  0xa8   :  { %53 = vst [vmem:[#allocation1] sm:$0xff] %v51_v12  ;;  %vm182_vm2 = vmand %vm164_vm0, %vm181_vm1 }
  0xaf   :  { %v56_v13 = vld [vmem:[#allocation1 + $0x1] ss:$0 sm:$0xff] }
  0xb0   :  { %v59_v14 = vmul.f32 %v56_v13, %v56_v13  ;;  %v66_v15 = vmul.f32 %v56_v13, %v51_v12  ;;  %v168_v13 = vld [vmem:[#allocation0 + $0x6] ss:$0 sm:$0xff] }
  0xb2   :  { %60 = vadd.xlane.f32.xlu1 %v59_v14 }
  0xb6   :  { %67 = vadd.xlane.f32.xlu1 %v66_v15 }
 0x13b   :  { %v61_v17 = vpop.xlane.xlu1 %60 }
 0x13c   :  { %v62_v18 = vsub.f32 %v58_v16, %v61_v17 }
 0x13e   :  { %252 = vrsqrt.f32 %v62_v18 }
 0x13f   :  { %v68_v19 = vpop.xlane.xlu1 %67 }
 0x140   :  { %v69_v20 = vsub.f32 %v280_v4, %v68_v19 }
 0x14b   :  { %v253_v21 = vpop.eup %252 }
 0x14c   :  { %v70_v22 = vmul.f32 %v253_v21, %v69_v20 }
 0x14e   :  { %v73_v23 = vsel %vm72_vm3, %v70_v22, 0.0  ;;  %vm186_vm3 = vcmask 64568  }
 0x14f   :  { %v74_v24 = vadd.f32 %v73_v23, %v51_v12  ;;  %vm204_vm5 = vmand %vm186_vm3, %vm203_vm4 }
 0x151   :  { %75 = vst [vmem:[#allocation1] sm:$0xff] %v74_v24 }
 0x158   :  { %v78_v25 = vld [vmem:[#allocation1 + $0x2] ss:$0 sm:$0xff] }
 0x159   :  { %v88_v26 = vmul.f32 %v78_v25, %v74_v24  ;;  %v81_v27 = vmul.f32 %v78_v25, %v78_v25  ;;  %v190_v25 = vld [vmem:[#allocation0 + $0x7] ss:$0 sm:$0xff] }
 0x15b   :  { %89 = vadd.xlane.f32.xlu1 %v88_v26  ;;  %82 = vadd.xlane.f32.xlu0 %v81_v27 }
 0x1e4   :  { %v83_v29 = vpop.xlane.xlu0 %82  ;;  %v90_v31 = vpop.xlane.xlu1 %89 }
 0x1e5   :  { %v84_v30 = vsub.f32 %v80_v28, %v83_v29  ;;  %v91_v32 = vsub.f32 %v280_v4, %v90_v31 }
 0x1e7   :  { %254 = vrsqrt.f32 %v84_v30 }
 0x1f4   :  { %v255_v33 = vpop.eup %254 }
 0x1f5   :  { %v92_v34 = vmul.f32 %v255_v33, %v91_v32 }
 0x1f7   :  { %v95_v35 = vsel %vm94_vm6, %v92_v34, 0.0 }
 0x1f8   :  { %v96_v36 = vadd.f32 %v95_v35, %v74_v24 }
 0x1fa   :  { %97 = vst [vmem:[#allocation1] sm:$0xff] %v96_v36 }
 0x201   :  { %v100_v37 = vld [vmem:[#allocation1 + $0x3] ss:$0 sm:$0xff] }
 0x202   :  { %v110_v38 = vmul.f32 %v100_v37, %v96_v36  ;;  %v103_v39 = vmul.f32 %v100_v37, %v100_v37 }
 0x204   :  { %111 = vadd.xlane.f32.xlu1 %v110_v38  ;;  %104 = vadd.xlane.f32.xlu0 %v103_v39 }
 0x28d   :  { %v105_v41 = vpop.xlane.xlu0 %104  ;;  %v112_v43 = vpop.xlane.xlu1 %111 }
 0x28e   :  { %v106_v42 = vsub.f32 %v102_v40, %v105_v41  ;;  %v113_v44 = vsub.f32 %v280_v4, %v112_v43 }
 0x290   :  { %256 = vrsqrt.f32 %v106_v42 }
 0x29d   :  { %v257_v45 = vpop.eup %256 }
 0x29e   :  { %v114_v46 = vmul.f32 %v257_v45, %v113_v44 }
 0x2a0   :  { %v117_v47 = vsel %vm116_vm9, %v114_v46, 0.0 }
 0x2a1   :  { %v118_v48 = vadd.f32 %v117_v47, %v96_v36 }
 0x2a3   :  { %119 = vst [vmem:[#allocation1] sm:$0xff] %v118_v48 }
 0x2aa   :  { %v122_v49 = vld [vmem:[#allocation1 + $0x4] ss:$0 sm:$0xff] }
 0x2ab   :  { %v132_v50 = vmul.f32 %v122_v49, %v118_v48  ;;  %v125_v51 = vmul.f32 %v122_v49, %v122_v49 }
 0x2ad   :  { %133 = vadd.xlane.f32.xlu1 %v132_v50  ;;  %126 = vadd.xlane.f32.xlu0 %v125_v51 }
 0x336   :  { %v127_v53 = vpop.xlane.xlu0 %126  ;;  %v134_v55 = vpop.xlane.xlu1 %133 }
 0x337   :  { %v128_v54 = vsub.f32 %v124_v52, %v127_v53  ;;  %v135_v56 = vsub.f32 %v280_v4, %v134_v55 }
 0x339   :  { %258 = vrsqrt.f32 %v128_v54 }
 0x346   :  { %v259_v57 = vpop.eup %258 }
 0x347   :  { %v136_v58 = vmul.f32 %v259_v57, %v135_v56 }
 0x349   :  { %v139_v59 = vsel %vm138_vm12, %v136_v58, 0.0 }
 0x34a   :  { %v140_v60 = vadd.f32 %v139_v59, %v118_v48 }
 0x34c   :  { %141 = vst [vmem:[#allocation1] sm:$0xff] %v140_v60 }
 0x353   :  { %v144_v61 = vld [vmem:[#allocation1 + $0x5] ss:$0 sm:$0xff] }
 0x354   :  { %v154_v62 = vmul.f32 %v144_v61, %v140_v60  ;;  %v147_v63 = vmul.f32 %v144_v61, %v144_v61 }
 0x356   :  { %155 = vadd.xlane.f32.xlu1 %v154_v62  ;;  %148 = vadd.xlane.f32.xlu0 %v147_v63 }
 0x3df   :  { %v149_v1 = vpop.xlane.xlu0 %148  ;;  %v156_v3 = vpop.xlane.xlu1 %155 }
 0x3e0   :  { %v150_v2 = vsub.f32 %v146_v0, %v149_v1  ;;  %v157_v5 = vsub.f32 %v280_v4, %v156_v3 }
 0x3e2   :  { %260 = vrsqrt.f32 %v150_v2 }
 0x3ef   :  { %v261_v6 = vpop.eup %260 }
 0x3f0   :  { %v158_v7 = vmul.f32 %v261_v6, %v157_v5 }
 0x3f2   :  { %v161_v8 = vsel %vm160_vm15, %v158_v7, 0.0 }
 0x3f3   :  { %v162_v9 = vadd.f32 %v161_v8, %v140_v60 }
 0x3f5   :  { %163 = vst [vmem:[#allocation1] sm:$0xff] %v162_v9 }
 0x3fc   :  { %v166_v10 = vld [vmem:[#allocation1 + $0x6] ss:$0 sm:$0xff] }
 0x3fd   :  { %v176_v11 = vmul.f32 %v166_v10, %v162_v9  ;;  %v169_v12 = vmul.f32 %v166_v10, %v166_v10 }
 0x3ff   :  { %177 = vadd.xlane.f32.xlu1 %v176_v11  ;;  %170 = vadd.xlane.f32.xlu0 %v169_v12 }
 0x488   :  { %v171_v14 = vpop.xlane.xlu0 %170  ;;  %v178_v16 = vpop.xlane.xlu1 %177 }
 0x489   :  { %v172_v15 = vsub.f32 %v168_v13, %v171_v14  ;;  %v179_v17 = vsub.f32 %v280_v4, %v178_v16 }
 0x48b   :  { %262 = vrsqrt.f32 %v172_v15 }
 0x498   :  { %v263_v18 = vpop.eup %262 }
 0x499   :  { %v180_v19 = vmul.f32 %v263_v18, %v179_v17 }
 0x49b   :  { %v183_v20 = vsel %vm182_vm2, %v180_v19, 0.0 }
 0x49c   :  { %v184_v21 = vadd.f32 %v183_v20, %v162_v9 }
 0x49e   :  { %185 = vst [vmem:[#allocation1] sm:$0xff] %v184_v21 }
 0x4a5   :  { %v188_v22 = vld [vmem:[#allocation1 + $0x7] ss:$0 sm:$0xff] }
 0x4a6   :  { %v198_v23 = vmul.f32 %v188_v22, %v184_v21  ;;  %v191_v24 = vmul.f32 %v188_v22, %v188_v22 }
 0x4a8   :  { %199 = vadd.xlane.f32.xlu1 %v198_v23  ;;  %192 = vadd.xlane.f32.xlu0 %v191_v24 }
 0x531   :  { %v193_v26 = vpop.xlane.xlu0 %192  ;;  %v200_v28 = vpop.xlane.xlu1 %199 }
 0x532   :  { %v194_v27 = vsub.f32 %v190_v25, %v193_v26  ;;  %v201_v29 = vsub.f32 %v280_v4, %v200_v28 }
 0x534   :  { %264 = vrsqrt.f32 %v194_v27 }
 0x541   :  { %v265_v30 = vpop.eup %264 }
 0x542   :  { %v202_v31 = vmul.f32 %v265_v30, %v201_v29 }
 0x544   :  { %v205_v32 = vsel %vm204_vm5, %v202_v31, 0.0 }
 0x545   :  { %v206_v33 = vadd.f32 %v205_v32, %v184_v21 }
 0x547   :  { %207 = vst [vmem:[#allocation1] sm:$0xff] %v206_v33  ;;  %237 = vst [vmem:[%s295_s1] sm:$0xff] %v206_v33 }

// kernel: custom-call.7
= control target key start
LH: loop header
LB: loop body
LE: loop exit
PB: predicated region body
PF: predicated region fallthrough
CT: control target
= control target key end

     0   :  { %v35_v0 = vlaneseq  ;;  %v182_v9 = vmov -1.0   ;;  %s217_s0 = inlined_call_operand.vmem [shape: f32[1,8,8], index: 0, kind: input, shape index: {}]   ;;  %s218_s1 = inlined_call_operand.vmem [shape: f32[1,8,8], index: 1, kind: output, shape index: {}]  }
   0x1   :  { %v30_v1 = vld [vmem:[%s217_s0] sm:$0xff] }
   0x2   :  { %v196_v2 = vand.u32 127, %v35_v0  ;;  %v39_v3 = vshrl.u32 %v35_v0, 7 }
   0x4   :  { %vm37_vm0 = vcmp.lt.s32.totalorder %v196_v2, 8  ;;  %vm41_vm1 = vcmp.eq.s32.totalorder %v39_v3, %v196_v2  ;;  %vm46_vm2 = vcmp.ge.s32.totalorder %v39_v3, %v196_v2  ;;  %vm60_vm4 = vcmp.eq.s32.totalorder %v196_v2, 0 }
   0x5   :  { %v43_v4 = vsel %vm41_vm1, %v30_v1, 0.0  ;;  %vm47_vm3 = vmand %vm46_vm2, %vm37_vm0  ;;  %vm57_vm5 = vcmp.eq.s32.totalorder %v196_v2, %v39_v3  ;;  %v61_v10 = vsel %vm60_vm4, 1.0, %v182_v9  ;;  %vm68_vm6 = vcmp.eq.s32.totalorder %v196_v2, 1 }
   0x6   :  { %v48_v5 = vsel %vm47_vm3, %v30_v1, 0.0  ;;  %44 = vadd.xlane.f32.xlu0 %v43_v4  ;;  %v62_v11 = vsel %vm57_vm5, %v61_v10, 0.0  ;;  %vm78_vm7 = vcmp.eq.s32.totalorder %v196_v2, 2  ;;  %vm88_vm8 = vcmp.eq.s32.totalorder %v196_v2, 3 }
   0x7   :  { %vm98_vm9 = vcmp.eq.s32.totalorder %v196_v2, 4  ;;  %vm108_vm10 = vcmp.eq.s32.totalorder %v196_v2, 5  ;;  %vm118_vm11 = vcmp.eq.s32.totalorder %v196_v2, 6  ;;  %vm128_vm12 = vcmp.eq.s32.totalorder %v196_v2, 7 }
  0x8f   :  { %v201_v6 = vpop.xlane.xlu0 %44 }
  0x90   :  { %180 = vrcp.f32 %v201_v6  ;;  %vm135_vm13 = vweird.f32 %v201_v6 }
  0x9d   :  { %v181_v7 = vpop.eup %180 }
  0x9e   :  { %v50_v8 = vmul.f32 %v181_v7, %v48_v5 }
  0xa0   :  { %51 = vst [vmem:[#allocation2] sm:$0xff] %v50_v8 }
  0xa7   :  { %v64_v12 = vld [vmem:[#allocation2 + $0x1] ss:$0 sm:$0xff]  ;;  %v74_v15 = vld [vmem:[#allocation2 + $0x2] ss:$0 sm:$0xff]  ;;  %v84_v20 = vld [vmem:[#allocation2 + $0x3] ss:$0 sm:$0xff] }
  0xa8   :  { %v65_v13 = vxor.u32 2147483648, %v64_v12  ;;  %v75_v17 = vxor.u32 2147483648, %v74_v15  ;;  %v85_v22 = vxor.u32 2147483648, %v84_v20  ;;  %v94_v25 = vld [vmem:[#allocation2 + $0x4] ss:$0 sm:$0xff] }
  0xa9   :  { %v95_v27 = vxor.u32 2147483648, %v94_v25  ;;  %v104_v30 = vld [vmem:[#allocation2 + $0x5] ss:$0 sm:$0xff]  ;;  %v114_v35 = vld [vmem:[#allocation2 + $0x6] ss:$0 sm:$0xff] }
  0xaa   :  { %v69_v14 = vmul.f32 %v65_v13, %v62_v11  ;;  %v105_v32 = vxor.u32 2147483648, %v104_v30  ;;  %v115_v37 = vxor.u32 2147483648, %v114_v35  ;;  %v124_v40 = vld [vmem:[#allocation2 + $0x7] ss:$0 sm:$0xff] }
  0xab   :  { %v125_v42 = vxor.u32 2147483648, %v124_v40 }
  0xac   :  { %70 = vadd.xlane.f32.xlu0 %v69_v14 }
 0x135   :  { %v71_v16 = vpop.xlane.xlu0 %70 }
 0x136   :  { %v72_v18 = vsel %vm68_vm6, %v71_v16, %v62_v11 }
 0x137   :  { %v79_v19 = vmul.f32 %v75_v17, %v72_v18 }
 0x139   :  { %80 = vadd.xlane.f32.xlu1 %v79_v19 }
 0x1c2   :  { %v81_v21 = vpop.xlane.xlu1 %80 }
 0x1c3   :  { %v82_v23 = vsel %vm78_vm7, %v81_v21, %v72_v18 }
 0x1c4   :  { %v89_v24 = vmul.f32 %v85_v22, %v82_v23 }
 0x1c6   :  { %90 = vadd.xlane.f32.xlu1 %v89_v24 }
 0x24f   :  { %v91_v26 = vpop.xlane.xlu1 %90 }
 0x250   :  { %v92_v28 = vsel %vm88_vm8, %v91_v26, %v82_v23 }
 0x251   :  { %v99_v29 = vmul.f32 %v95_v27, %v92_v28 }
 0x253   :  { %100 = vadd.xlane.f32.xlu0 %v99_v29 }
 0x2dc   :  { %v101_v31 = vpop.xlane.xlu0 %100 }
 0x2dd   :  { %v102_v33 = vsel %vm98_vm9, %v101_v31, %v92_v28 }
 0x2de   :  { %v109_v34 = vmul.f32 %v105_v32, %v102_v33 }
 0x2e0   :  { %110 = vadd.xlane.f32.xlu1 %v109_v34 }
 0x369   :  { %v111_v36 = vpop.xlane.xlu1 %110 }
 0x36a   :  { %v112_v38 = vsel %vm108_vm10, %v111_v36, %v102_v33 }
 0x36b   :  { %v119_v39 = vmul.f32 %v115_v37, %v112_v38 }
 0x36d   :  { %120 = vadd.xlane.f32.xlu0 %v119_v39 }
 0x3f6   :  { %v121_v41 = vpop.xlane.xlu0 %120 }
 0x3f7   :  { %v122_v43 = vsel %vm118_vm11, %v121_v41, %v112_v38 }
 0x3f8   :  { %v129_v44 = vmul.f32 %v125_v42, %v122_v43 }
 0x3fa   :  { %130 = vadd.xlane.f32.xlu1 %v129_v44 }
 0x483   :  { %v131_v45 = vpop.xlane.xlu1 %130 }
 0x484   :  { %v132_v46 = vsel %vm128_vm12, %v131_v45, %v122_v43 }
 0x485   :  { %v134_v47 = vmul.f32 %v181_v7, %v132_v46 }
 0x487   :  { %v136_v48 = vsel %vm135_vm13, %v132_v46, %v134_v47 }
 0x488   :  { %167 = vst [vmem:[%s218_s1] sm:$0xff] %v136_v48 }

// kernel: variational_strategy_forward.4
= control target key start
LH: loop header
LB: loop body
LE: loop exit
PB: predicated region body
PF: predicated region fallthrough
CT: control target
= control target key end

     0   :  { %vm19_vm0 = vcmask 31744   ;;  %v138_v0 = vmov 0.0   ;;  %vm139_vm1 = vmmov 0   ;;  %v140_v4 = vmov 0   ;;  %s181_s3 = inlined_call_operand.vmem [shape: f32[8,4], index: 3, kind: input, shape index: {}, may-alias: {2,3}]   ;;  %s182_s2 = inlined_call_operand.vmem [shape: f32[8,4], index: 2, kind: input, shape index: {}, may-alias: {2,3}]   ;;  %s183_s0 = inlined_call_operand.vmem [shape: f32[8,1], index: 0, kind: input, shape index: {}]   ;;  %s184_s1 = inlined_call_operand.vmem [shape: f32[1,8], index: 1, kind: input, shape index: {}]   ;;  %s185_s4 = inlined_call_operand.vmem [shape: f32[8,8], index: 4, kind: output, shape index: {}]  }
   0x1   :  { %127 = vmatprep.subr.mxu0 %v138_v0  ;;  %v18_v1 = vld [vmem:[%s181_s3] sm:$0xff]  ;;  %129 = vmatprep.mubr.msk.f32.mxu0 %vm139_vm1, %v138_v0  ;;  %vm116_vm2 = vcmask 64512  }
   0x2   :  { %v96_v2 = vld [vmem:[%s183_s0] sm:$0xff]  ;;  %128 = vmatpush3.xpose.msk.msra.mxu0 %vm19_vm0, %v18_v1  ;;  %135 = vset.pattern.permute.xlu0 %v140_v4 }
   0x3   :  { %v17_v3 = vld [vmem:[%s182_s2] sm:$0xff]  ;;  %100 = vperm.xlu0 %135, %v96_v2  }
   0x4   :  { %v124_v5 = vld [vmem:[%s184_s1] ss:$0 sm:$0xff] }
   0x5   :  { %130 = vmatmul.mubr.msk.f32.vlgmr.msra.gmra.mxu0 %vm19_vm0, %v17_v3 }
  0x7e   :  { %v101_v6 = vpop.permute.xlu0 %100 }
  0x7f   :  { %v109_v7 = vadd.f32 %v124_v5, %v101_v6 }
  0xc5   :  { %v92_v8 = vpop.f32.mrf.mxu0 }
  0xc6   :  { %v110_v9 = vmul.f32 2.0, %v92_v8 }
  0xc7   :  { %v131_v10 = vpop.f32.mrf.mxu0 }
  0xc8   :  { %v111_v11 = vsub.f32 %v109_v7, %v110_v9 }
  0xca   :  { %v112_v12 = vmax.f32 %v111_v11, 0.0 }
  0xcc   :  { %v113_v13 = vmul.f32 -0.5, %v112_v12 }
  0xce   :  { %v114_v14 = vmul.f32 1.442695, %v113_v13 }
  0xd0   :  { %136 = vpow2.f32 %v114_v14 }
  0xdd   :  { %v137_v15 = vpop.eup %136 }
  0xde   :  { %117 = vst.msk [vmem:[%s185_s4] sm:$0xff] %vm116_vm2, %v137_v15 }

// kernel: variational_strategy_forward.5
= control target key start
LH: loop header
LB: loop body
LE: loop exit
PB: predicated region body
PF: predicated region fallthrough
CT: control target
= control target key end

     0   :  { %vm20_vm0 = vcmask 31744   ;;  %v146_v0 = vmov 0.0   ;;  %vm147_vm1 = vmmov 0   ;;  %v148_v2 = vmov 0   ;;  %s195_s3 = inlined_call_operand.vmem [shape: f32[16,4], index: 3, kind: input, shape index: {}]   ;;  %s196_s0 = inlined_call_operand.vmem [shape: f32[8,1], index: 0, kind: input, shape index: {}]   ;;  %s197_s2 = inlined_call_operand.vmem [shape: f32[8,4], index: 2, kind: input, shape index: {}]   ;;  %s198_s1 = inlined_call_operand.vmem [shape: f32[1,16], index: 1, kind: input, shape index: {}]   ;;  %s199_s4 = inlined_call_operand.vmem [shape: f32[8,16], index: 4, kind: output, shape index: {}]  }
   0x1   :  { %133 = vmatprep.subr.mxu0 %v146_v0  ;;  %v19_v1 = vld [vmem:[%s195_s3 + $0x8] sm:$0xff]  ;;  %137 = vmatprep.mubr.msk.f32.mxu0 %vm147_vm1, %v146_v0  ;;  %v100_v3 = vld [vmem:[%s196_s0] sm:$0xff]  ;;  %vm120_vm2 = vcmask 130048  }
   0x2   :  { %134 = vmatpush3.xpose.msk.msra.mxu0 %vm20_vm0, %v19_v1  ;;  %143 = vset.pattern.permute.xlu0 %v148_v2  ;;  %v18_v4 = vld [vmem:[%s195_s3] sm:$0xff] }
   0x3   :  { %135 = vmatprep.subr.mxu0 %v146_v0  ;;  %104 = vperm.xlu0 %143, %v100_v3   ;;  %v17_v5 = vld [vmem:[%s197_s2] sm:$0xff] }
   0x4   :  { %v129_v6 = vld [vmem:[%s198_s1] ss:$0 sm:$0xff] }
   0x6   :  { %136 = vmatpush3.xpose.msk.msra.mxu0 %vm20_vm0, %v18_v4 }
   0x9   :  { %138 = vmatmul.mubr.msk.f32.vlgmr.msra.gmra.mxu0 %vm20_vm0, %v17_v5 }
  0x7e   :  { %v105_v7 = vpop.permute.xlu0 %104 }
  0x7f   :  { %v113_v8 = vadd.f32 %v129_v6, %v105_v7 }
  0xc9   :  { %v96_v9 = vpop.f32.mrf.mxu0 }
  0xca   :  { %v114_v10 = vmul.f32 2.0, %v96_v9 }
  0xcb   :  { %v139_v11 = vpop.f32.mrf.mxu0 }
  0xcc   :  { %v115_v12 = vsub.f32 %v113_v8, %v114_v10 }
  0xce   :  { %v116_v13 = vmax.f32 %v115_v12, 0.0 }
  0xd0   :  { %v117_v14 = vmul.f32 -0.5, %v116_v13 }
  0xd2   :  { %v118_v15 = vmul.f32 1.442695, %v117_v14 }
  0xd4   :  { %144 = vpow2.f32 %v118_v15 }
  0xe1   :  { %v145_v16 = vpop.eup %144 }
  0xe2   :  { %121 = vst.msk [vmem:[%s199_s4] sm:$0xff] %vm120_vm2, %v145_v16 }

// kernel: variational_strategy_forward.6
= control target key start
LH: loop header
LB: loop body
LE: loop exit
PB: predicated region body
PF: predicated region fallthrough
CT: control target
= control target key end

     0   :  { %vm29_vm0 = vcmask 130048   ;;  %v95_v3 = vmov 0   ;;  %s149_s0 = inlined_call_operand.vmem [shape: f32[8,1], index: 0, kind: input, shape index: {}]   ;;  %s150_s1 = inlined_call_operand.vmem [shape: f32[1,16], index: 1, kind: input, shape index: {}]   ;;  %s151_s2 = inlined_call_operand.vmem [shape: f32[8,16], index: 2, kind: input, shape index: {}]   ;;  %s152_s3 = inlined_call_operand.vmem [shape: f32[8,16], index: 3, kind: input, shape index: {}]   ;;  %s153_s4 = inlined_call_operand.hbm [shape: f32[1,16], index: 4, kind: output, shape index: {0}]   ;;  %s154_s5 = inlined_call_operand.vmem [shape: f32[1,16], index: 5, kind: output, shape index: {1}]  }
   0x1   :  { %v22_v0 = vld [vmem:[%s149_s0] sm:$0xff]  ;;  %72 = vset.pattern.permute.xlu0 %v95_v3 }
   0x2   :  { %v40_v1 = vld [vmem:[%s152_s3] sm:$0xff] }
   0x3   :  { %v20_v2 = vld [vmem:[%s151_s2] sm:$0xff] }
   0x4   :  { %v41_v4 = vmul.f32 %v40_v1, %v20_v2 }
   0x5   :  { %11 = vsyncpa [#allocation3], 0  ;;  %25 = vperm.xlu0 %72, %v22_v0   ;;  %vm38_vm1 = vcmask 122880   ;;  %v21_v22 = vld [vmem:[%s150_s1] sm:$0x1]  ;;  %s96_s25 = smov [#allocation2]  }
   0x6   :  { %v42_v5 = vsel %vm29_vm0, %v41_v4, 0.0  ;;  %s58_s26 = sshll.u32 %s96_s25, 4  ;;  %s59_s26 = int_to_ptr.vmem [resolvable:$true] %s58_s26 }
   0x7   :  { %v43_v6 = vrot.slane %v42_v5, 4  ;;  %s77_s27 = scalar_lea.vmem %s59_s26, 32  ;;  %p78_p1 = scmp.lt.s32.totalorder %s59_s26, %s59_s26 }
   0x9   :  { %v44_v7 = vadd.f32 %v43_v6, %v42_v5 }
   0xb   :  { %v45_v8 = vrot.slane %v44_v7, 2 }
   0xd   :  { %v46_v9 = vadd.f32 %v45_v8, %v44_v7 }
   0xf   :  { %v47_v10 = vrot.slane %v46_v9, 1 }
  0x11   :  { %v48_v11 = vadd.f32 %v47_v10, %v46_v9 }
  0x13   :  { %v49_v12 = vsub.f32 1.0, %v48_v11 }
  0x15   :  { %v50_v13 = vmax.f32 %v49_v12, 0.0 }
  0x17   :  { %51 = vst.msk [vmem:[%s154_s5] sm:$0x1] %vm38_vm1, %v50_v13  ;;  %s73_s5 = scalar_lea.vmem %s59_s26, 16 }
  0x18   :  { %p74_p0 = scmp.ne.s32.totalorder %s59_s26, %s73_s5  ;;  %p79_p2 = scmp.lt.s32.totalorder %s77_s27, %s73_s5 }
  0x1a   :  { %p80_p3 = por %p79_p2, %p78_p1 }
  0x1c   :  { %p81_p4 = pnand %p80_p3, %p74_p0 }
  0x80   :  { %v26_v14 = vpop.permute.xlu0 %25 }
  0x81   :  { %v28_v15 = vmul.f32 %v26_v14, %v20_v2 }
  0x83   :  { %v30_v16 = vsel %vm29_vm0, %v28_v15, 0.0 }
  0x84   :  { %v31_v17 = vrot.slane %v30_v16, 4 }
  0x86   :  { %v32_v18 = vadd.f32 %v31_v17, %v30_v16 }
  0x88   :  { %v33_v19 = vrot.slane %v32_v18, 2 }
  0x8a   :  { %v34_v20 = vadd.f32 %v33_v19, %v32_v18 }
  0x8c   :  { %v35_v21 = vrot.slane %v34_v20, 1 }
  0x8e   :  { %v36_v23 = vadd.f32 %v35_v21, %v34_v20 }
  0x90   :  { %v37_v24 = vadd.f32 %v36_v23, %v21_v22 }
  0x92   :  { %39 = vst.msk [vmem:[#allocation2] sm:$0x1] %vm38_vm1, %v37_v24 }
  0x93   :  { %84 = shalt.err (!%p81_p4)
}
  0x94   :  { %61 = dma.vmem_to_hbm [thread:$0]  %s59_s26, 16, %s153_s4, [#allocation3]  }
  0x95   :  { %93 = dma.done.wait [#allocation3], 16  }
  0x96   :  { %94 = vsyncadd [#allocation3], 4294967280 }
  0x97   :  { %69 = vsyncpa [#allocation3], 1 }

// kernel: variational_strategy_forward.7
= control target key start
LH: loop header
LB: loop body
LE: loop exit
PB: predicated region body
PF: predicated region fallthrough
CT: control target
= control target key end

     0   :  { %vm19_vm0 = vcmask 64512   ;;  %s237_s0 = inlined_call_operand.vmem [shape: f32[16,8], index: 0, kind: input, shape index: {}, may-alias: {0,1}]   ;;  %s238_s1 = inlined_call_operand.vmem [shape: f32[16,8], index: 1, kind: input, shape index: {}, may-alias: {0,1}]   ;;  %s239_s2 = inlined_call_operand.vmem [shape: f32[1,16], index: 2, kind: input, shape index: {}]   ;;  %s240_s3 = inlined_call_operand.hbm [shape: f32[16,16], index: 3, kind: output, shape index: {}]  }
   0x1   :  { %v18_v0 = vld [vmem:[%s238_s1 + $0x8] sm:$0xff]  ;;  %v17_v1 = vld [vmem:[%s238_s1] sm:$0xff] }
   0x2   :  { %v15_v2 = vld [vmem:[%s237_s0] sm:$0xff]  ;;  %164 = vmatprep.subr.msk.mxu0 %vm19_vm0, %v18_v0 }
   0x3   :  { %168 = vmatprep.mubr.msk.f32.mxu0 %vm19_vm0, %v15_v2 }
   0x4   :  { %8 = vsyncpa [#allocation3], 0  ;;  %165 = vmatpush3.xpose.msk.msra.mxu0 %vm19_vm0, %v18_v0  ;;  %v16_v3 = vld [vmem:[%s237_s0 + $0x8] sm:$0xff]  ;;  %v111_v4 = vlaneseq  ;;  %v159_v8 = vld [vmem:[%s239_s2] ss:$0 sm:$0xff]  ;;  %s196_s21 = smov [#allocation2]  }
   0x5   :  { %166 = vmatprep.subr.msk.mxu0 %vm19_vm0, %v17_v1  ;;  %s144_s22 = sshll.u32 %s196_s21, 4  ;;  %vm129_vm3 = vcmask 130048   ;;  %s145_s22 = int_to_ptr.vmem [resolvable:$true] %s144_s22 }
   0x6   :  { %v112_v5 = vshrl.u32 %v111_v4, 7  ;;  %v115_v7 = vand.u32 127, %v111_v4  ;;  %s174_s0 = scalar_lea.vmem %s145_s22, 256  ;;  %p179_p1 = scmp.lt.s32.totalorder %s145_s22, %s145_s22 }
   0x7   :  { %p175_p0 = scmp.ne.s32.totalorder %s145_s22, %s174_s0  ;;  %p180_p2 = scmp.lt.s32.totalorder %s174_s0, %s174_s0 }
   0x8   :  { %167 = vmatpush3.xpose.msk.msra.mxu0 %vm19_vm0, %v17_v1  ;;  %v113_v6 = vadd.s32 8, %v112_v5  ;;  %vm116_vm2 = vcmp.eq.s32.totalorder %v112_v5, %v115_v7 }
   0x9   :  { %v125_v11 = vsel %vm116_vm2, %v159_v8, 0.0  ;;  %p181_p3 = por %p180_p2, %p179_p1 }
   0xa   :  { %vm117_vm1 = vcmp.eq.s32.totalorder %v113_v6, %v115_v7 }
   0xb   :  { %169 = vmatmul.mubr.msk.f32.vlgmr.msra.gmra.mxu0 %vm19_vm0, %v16_v3  ;;  %v126_v9 = vsel %vm117_vm1, %v159_v8, 0.0  ;;  %p182_p4 = pnand %p181_p3, %p175_p0 }
  0xcb   :  { %v170_v10 = vpop.f32.mrf.mxu0 }
  0xcc   :  { %v128_v12 = vadd.f32 %v170_v10, %v126_v9 }
  0xcd   :  { %v98_v13 = vpop.f32.mrf.mxu0 }
  0xce   :  { %131 = vst.msk [vmem:[#allocation2 + $0x8] sm:$0xff] %vm129_vm3, %v128_v12  ;;  %v127_v14 = vadd.f32 %v125_v11, %v98_v13 }
  0xd0   :  { %130 = vst.msk [vmem:[#allocation2] sm:$0xff] %vm129_vm3, %v127_v14 }
  0xd1   :  { %185 = shalt.err (!%p182_p4)
}
  0xd2   :  { %s197_s2 = smov 128   ;;  %s198_s23 = smov 8  }
  0xd3   :  { %150 = dma.vmem_to_hbm [thread:$0]  %s145_s22, 256, %s240_s3, [#allocation3], %s197_s2, %s197_s2, %s198_s23  }
  0xd4   :  { %194 = dma.done.wait [#allocation3], 256  }
  0xd5   :  { %195 = vsyncadd [#allocation3], 4294967040 }
  0xd6   :  { %154 = vsyncpa [#allocation3], 1 }

</bundles_post_ra>
